<compile_context>
chip_gen: v7x
topology: tpu7x:2x2x1
jax: 0.10.0
libtpu: 0.0.40
codegen_flags: <defaults>
</compile_context>

<pallas_src>
import functools
import math

import jax
import jax.numpy as jnp
import numpy as np
from jax.experimental import pallas as pl
from jax.experimental.pallas import tpu as pltpu

KH, KW = 5, 5
C_IN, C_OUT = 4, 32
PAD = 2
CLAMP_MIN = -6.0  # torch.clamp_min bound (module default)
CLAMP_MAX = -6.0  # torch.clamp_max bound (module default)


def _conv_band_clamp_kernel(x_ref, w_ref, b_ref, o_ref, *, clamp_lo, clamp_hi):
    """One batch element per grid step.

    x_ref: (1, Hp, Wp*C_IN)         padded input, (W, C) fused on the lane axis
    w_ref: (KH, Wp*C_IN, W*C_OUT)   banded (block-Toeplitz) conv weights
    b_ref: (1, W*C_OUT)             bias tiled over output width
    o_ref: (1, H, W*C_OUT)          lane-dense fused output (NHWC-contiguous)
    """
    h_out = o_ref.shape[1]
    x = x_ref[0]                                   # (Hp, Wp*C_IN), loaded once
    acc = jnp.zeros((h_out, o_ref.shape[2]), jnp.float32)
    for kh in range(KH):                           # 5 matmuls, K = Wp*C_IN
        acc += jnp.dot(x[kh:kh + h_out, :], w_ref[kh],
                       preferred_element_type=jnp.float32)
    acc = acc + b_ref[...]
    acc = jnp.maximum(acc, clamp_lo)               # torch.clamp_min
    acc = jnp.minimum(acc, clamp_hi)               # torch.clamp_max
    o_ref[0] = acc.astype(o_ref.dtype)


def conv2d_clamp(x_nchw, weight, bias, clamp_lo, clamp_hi):
    """x_nchw: (N, 4, H, W); weight: (32, 4, 5, 5); bias: (32,). Returns NCHW."""
    n, c, h, w = x_nchw.shape
    assert c == C_IN
    hp, wp = h + 2 * PAD, w + 2 * PAD

    # ---- input: NCHW -> padded, (W, C)-fused channels-last (lane axis = Wp*C_IN) ----
    x_nhwc = jnp.transpose(x_nchw, (0, 2, 3, 1))
    x_pad = jnp.pad(x_nhwc, ((0, 0), (PAD, PAD), (PAD, PAD), (0, 0)))
    x_fused = x_pad.reshape(n, hp, wp * C_IN)

    # ---- weights: fold kw taps + input channels into a banded matrix ----
    # band[kh, wi*C_IN + ci, wo*C_OUT + co] = weight[co, ci, kh, wi - wo]
    #   (nonzero only for 0 <= wi - wo < KW)
    w_hwio = jnp.transpose(weight, (2, 3, 1, 0))          # (KH, KW, C_IN, C_OUT)
    sel = np.zeros((KW, wp, w), dtype=np.float32)         # static selection tensor
    for kw in range(KW):
        for wo in range(w):
            sel[kw, wo + kw, wo] = 1.0
    band = jnp.einsum("kpq,akco->apcqo", jnp.asarray(sel), w_hwio)
    band = band.reshape(KH, wp * C_IN, w * C_OUT)

    bias_row = jnp.tile(bias, w).reshape(1, w * C_OUT)    # [wo*C_OUT + co] = bias[co]

    kernel = functools.partial(_conv_band_clamp_kernel,
                               clamp_lo=float(clamp_lo), clamp_hi=float(clamp_hi))

    out_fused = pl.pallas_call(
        kernel,
        out_shape=jax.ShapeDtypeStruct((n, h, w * C_OUT), jnp.float32),
        grid=(n,),
        in_specs=[
            pl.BlockSpec((1, hp, wp * C_IN), lambda b: (b, 0, 0)),
            pl.BlockSpec((KH, wp * C_IN, w * C_OUT), lambda b: (0, 0, 0)),
            pl.BlockSpec((1, w * C_OUT), lambda b: (0, 0)),
        ],
        out_specs=pl.BlockSpec((1, h, w * C_OUT), lambda b: (b, 0, 0)),
        compiler_params=pltpu.CompilerParams(dimension_semantics=("parallel",)),
    )(x_fused, band, bias_row)

    # Fused output is NHWC-contiguous -> free reshape, then one transpose to NCHW.
    return jnp.transpose(out_fused.reshape(n, h, w, C_OUT), (0, 3, 1, 2))


@jax.jit
def model_forward(x_nchw, weight, bias):
    return conv2d_clamp(x_nchw, weight, bias, CLAMP_MIN, CLAMP_MAX)


if __name__ == "__main__":
    key = jax.random.PRNGKey(0)
    k_x, k_w, k_b = jax.random.split(key, 3)

    N, H, W = 2, 16, 16
    x = jax.random.normal(k_x, (N, C_IN, H, W), dtype=jnp.float32)

    # PyTorch-style uniform init with bound 1/sqrt(fan_in)
    fan_in = C_IN * KH * KW
    bound = 1.0 / math.sqrt(fan_in)
    weight = jax.random.uniform(k_w, (C_OUT, C_IN, KH, KW),
                                minval=-bound, maxval=bound, dtype=jnp.float32)
    bias = jax.random.uniform(k_b, (C_OUT,),
                              minval=-bound, maxval=bound, dtype=jnp.float32)

    out = jax.block_until_ready(model_forward(x, weight, bias))
    assert out.shape == (N, C_OUT, H, W)
    # clamp_min(-6) then clamp_max(-6) collapses every finite value to exactly -6
    assert bool(jnp.all(out == CLAMP_MAX))

    # Validate the conv path itself (with non-degenerate clamps) against XLA's conv.
    raw = jax.block_until_ready(
        jax.jit(lambda a, wg, b: conv2d_clamp(a, wg, b, float("-inf"), float("inf")))(
            x, weight, bias))
    ref = jax.lax.conv_general_dilated(
        x, weight, window_strides=(1, 1), padding=((PAD, PAD), (PAD, PAD)),
        dimension_numbers=("NCHW", "OIHW", "NCHW"),
        precision=jax.lax.Precision.HIGHEST) + bias.reshape(1, C_OUT, 1, 1)
    assert bool(jnp.allclose(raw, ref, atol=2e-2, rtol=2e-2))

    print("KERNEL_OK")
</pallas_src>

<mosaic_0001>
module attributes {stable_mosaic.version = 11 : i64} {
  func.func @_conv_band_clamp_kernel(%arg0: i32, %arg1: memref<1x20x80xf32, #tpu.memory_space<vmem>>, %arg2: memref<5x80x512xf32, #tpu.memory_space<vmem>>, %arg3: memref<1x512xf32, #tpu.memory_space<vmem>>, %arg4: memref<1x16x512xf32, #tpu.memory_space<vmem>>) attributes {dimension_semantics = [#tpu.dimension_semantics<parallel>], iteration_bounds = array<i64: 2>, scalar_prefetch = 0 : i64, scratch_operands = 0 : i64, tpu.core_type = #tpu.core_type<tc>, window_params = [{transform_indices = @transform_0, window_bounds = array<i64: 1, 20, 80>}, {pipeline_mode = #tpu.pipeline_mode<synchronous>, transform_indices = @transform_1, window_bounds = array<i64: 5, 80, 512>}, {pipeline_mode = #tpu.pipeline_mode<synchronous>, transform_indices = @transform_2, window_bounds = array<i64: 1, 512>}, {transform_indices = @transform_3, window_bounds = array<i64: 1, 16, 512>}]} {
    %c0 = arith.constant 0 : index
    %c0_0 = arith.constant 0 : index
    %c0_1 = arith.constant 0 : index
    %0 = vector.load %arg1[%c0, %c0_0, %c0_1] : memref<1x20x80xf32, #tpu.memory_space<vmem>>, vector<1x20x80xf32>
    %1 = vector.shape_cast %0 : vector<1x20x80xf32> to vector<20x80xf32>
    %cst = arith.constant 0.000000e+00 : f32
    %2 = vector.broadcast %cst : f32 to vector<16x512xf32>
    %3 = vector.extract_strided_slice %1 {offsets = [0, 0], sizes = [16, 80], strides = [1, 1]} : vector<20x80xf32> to vector<16x80xf32>
    %c0_2 = arith.constant 0 : index
    %c0_3 = arith.constant 0 : index
    %c0_4 = arith.constant 0 : index
    %4 = vector.load %arg2[%c0_2, %c0_3, %c0_4] : memref<5x80x512xf32, #tpu.memory_space<vmem>>, vector<1x80x512xf32>
    %5 = vector.shape_cast %4 : vector<1x80x512xf32> to vector<80x512xf32>
    %cst_5 = arith.constant dense<0.000000e+00> : vector<16x512xf32>
    %6 = tpu.matmul %3, %5, %cst_5 {dimension_numbers = #tpu.dot_dimension_numbers<[1], [0], [0], [1], [0, 0, 1, 1], [], []>} : vector<16x80xf32>, vector<80x512xf32>, vector<16x512xf32> -> vector<16x512xf32>
    %7 = arith.addf %2, %6 : vector<16x512xf32>
    %8 = vector.extract_strided_slice %1 {offsets = [1, 0], sizes = [16, 80], strides = [1, 1]} : vector<20x80xf32> to vector<16x80xf32>
    %c1 = arith.constant 1 : index
    %c0_6 = arith.constant 0 : index
    %c0_7 = arith.constant 0 : index
    %9 = vector.load %arg2[%c1, %c0_6, %c0_7] : memref<5x80x512xf32, #tpu.memory_space<vmem>>, vector<1x80x512xf32>
    %10 = vector.shape_cast %9 : vector<1x80x512xf32> to vector<80x512xf32>
    %cst_8 = arith.constant dense<0.000000e+00> : vector<16x512xf32>
    %11 = tpu.matmul %8, %10, %cst_8 {dimension_numbers = #tpu.dot_dimension_numbers<[1], [0], [0], [1], [0, 0, 1, 1], [], []>} : vector<16x80xf32>, vector<80x512xf32>, vector<16x512xf32> -> vector<16x512xf32>
    %12 = arith.addf %7, %11 : vector<16x512xf32>
    %13 = vector.extract_strided_slice %1 {offsets = [2, 0], sizes = [16, 80], strides = [1, 1]} : vector<20x80xf32> to vector<16x80xf32>
    %c2 = arith.constant 2 : index
    %c0_9 = arith.constant 0 : index
    %c0_10 = arith.constant 0 : index
    %14 = vector.load %arg2[%c2, %c0_9, %c0_10] : memref<5x80x512xf32, #tpu.memory_space<vmem>>, vector<1x80x512xf32>
    %15 = vector.shape_cast %14 : vector<1x80x512xf32> to vector<80x512xf32>
    %cst_11 = arith.constant dense<0.000000e+00> : vector<16x512xf32>
    %16 = tpu.matmul %13, %15, %cst_11 {dimension_numbers = #tpu.dot_dimension_numbers<[1], [0], [0], [1], [0, 0, 1, 1], [], []>} : vector<16x80xf32>, vector<80x512xf32>, vector<16x512xf32> -> vector<16x512xf32>
    %17 = arith.addf %12, %16 : vector<16x512xf32>
    %18 = vector.extract_strided_slice %1 {offsets = [3, 0], sizes = [16, 80], strides = [1, 1]} : vector<20x80xf32> to vector<16x80xf32>
    %c3 = arith.constant 3 : index
    %c0_12 = arith.constant 0 : index
    %c0_13 = arith.constant 0 : index
    %19 = vector.load %arg2[%c3, %c0_12, %c0_13] : memref<5x80x512xf32, #tpu.memory_space<vmem>>, vector<1x80x512xf32>
    %20 = vector.shape_cast %19 : vector<1x80x512xf32> to vector<80x512xf32>
    %cst_14 = arith.constant dense<0.000000e+00> : vector<16x512xf32>
    %21 = tpu.matmul %18, %20, %cst_14 {dimension_numbers = #tpu.dot_dimension_numbers<[1], [0], [0], [1], [0, 0, 1, 1], [], []>} : vector<16x80xf32>, vector<80x512xf32>, vector<16x512xf32> -> vector<16x512xf32>
    %22 = arith.addf %17, %21 : vector<16x512xf32>
    %23 = vector.extract_strided_slice %1 {offsets = [4, 0], sizes = [16, 80], strides = [1, 1]} : vector<20x80xf32> to vector<16x80xf32>
    %c4 = arith.constant 4 : index
    %c0_15 = arith.constant 0 : index
    %c0_16 = arith.constant 0 : index
    %24 = vector.load %arg2[%c4, %c0_15, %c0_16] : memref<5x80x512xf32, #tpu.memory_space<vmem>>, vector<1x80x512xf32>
    %25 = vector.shape_cast %24 : vector<1x80x512xf32> to vector<80x512xf32>
    %cst_17 = arith.constant dense<0.000000e+00> : vector<16x512xf32>
    %26 = tpu.matmul %23, %25, %cst_17 {dimension_numbers = #tpu.dot_dimension_numbers<[1], [0], [0], [1], [0, 0, 1, 1], [], []>} : vector<16x80xf32>, vector<80x512xf32>, vector<16x512xf32> -> vector<16x512xf32>
    %27 = arith.addf %22, %26 : vector<16x512xf32>
    %c0_18 = arith.constant 0 : index
    %c0_19 = arith.constant 0 : index
    %28 = vector.load %arg3[%c0_18, %c0_19] : memref<1x512xf32, #tpu.memory_space<vmem>>, vector<1x512xf32>
    %29 = vector.broadcast %28 : vector<1x512xf32> to vector<16x512xf32>
    %30 = arith.addf %27, %29 : vector<16x512xf32>
    %cst_20 = arith.constant -6.000000e+00 : f32
    %31 = vector.broadcast %cst_20 : f32 to vector<16x512xf32>
    %32 = arith.maximumf %30, %31 : vector<16x512xf32>
    %cst_21 = arith.constant -6.000000e+00 : f32
    %33 = vector.broadcast %cst_21 : f32 to vector<16x512xf32>
    %34 = arith.minimumf %32, %33 : vector<16x512xf32>
    %c0_22 = arith.constant 0 : index
    %c0_23 = arith.constant 0 : index
    %c0_24 = arith.constant 0 : index
    %35 = vector.load %arg4[%c0_22, %c0_23, %c0_24] : memref<1x16x512xf32, #tpu.memory_space<vmem>>, vector<1x16x512xf32>
    %36 = vector.shape_cast %35 : vector<1x16x512xf32> to vector<16x512xf32>
    %37 = vector.shape_cast %34 : vector<16x512xf32> to vector<1x16x512xf32>
    tpu.vector_store %arg4[%c0_22, %c0_23, %c0_24], %37 {strides = array<i32>} : memref<1x16x512xf32, #tpu.memory_space<vmem>>, vector<1x16x512xf32>,
    return
  }
  func.func @transform_0(%arg0: i32) -> (i32, i32, i32) {
    %c0_i32 = arith.constant 0 : i32
    %c0_i32_0 = arith.constant 0 : i32
    %c0_i32_1 = arith.constant 0 : i32
    return %arg0, %c0_i32, %c0_i32_0 : i32, i32, i32
  }
  func.func @transform_1(%arg0: i32) -> (i32, i32, i32) {
    %c0_i32 = arith.constant 0 : i32
    %c0_i32_0 = arith.constant 0 : i32
    %c0_i32_1 = arith.constant 0 : i32
    %c0_i32_2 = arith.constant 0 : i32
    return %c0_i32, %c0_i32_0, %c0_i32_1 : i32, i32, i32
  }
  func.func @transform_2(%arg0: i32) -> (i32, i32) {
    %c0_i32 = arith.constant 0 : i32
    %c0_i32_0 = arith.constant 0 : i32
    %c0_i32_1 = arith.constant 0 : i32
    return %c0_i32, %c0_i32_0 : i32, i32
  }
  func.func @transform_3(%arg0: i32) -> (i32, i32, i32) {
    %c0_i32 = arith.constant 0 : i32
    %c0_i32_0 = arith.constant 0 : i32
    %c0_i32_1 = arith.constant 0 : i32
    return %arg0, %c0_i32, %c0_i32_0 : i32, i32, i32
  }
}

</mosaic_0001>

<bundles_post_ra>
// kernel: tile.8
= control target key start
LH: loop header
LB: loop body
LE: loop exit
PB: predicated region body
PF: predicated region fallthrough
CT: control target
= control target key end

     0   :  { %s28_s0 = inlined_call_operand.vmem [shape: f32[32], index: 0, kind: input, shape index: {}]   ;;  %s29_s1 = inlined_call_operand.vmem [shape: f32[16,32], index: 1, kind: output, shape index: {}]  }
   0x1   :  { %v4_v0 = vld [vmem:[%s28_s0] ss:$0 sm:$0xff] }
   0x2   :  { %5 = vst [vmem:[%s29_s1] sm:$0xff] %v4_v0  ;;  %8 = vst [vmem:[%s29_s1 + $0x8] sm:$0xff] %v4_v0 }

// kernel: tile.9
= control target key start
LH: loop header
LB: loop body
LE: loop exit
PB: predicated region body
PF: predicated region fallthrough
CT: control target
= control target key end

     0   :  { %s57_s8 = smov 96   ;;  %vm3_vm0 = vcmask 261120   ;;  %s59_s15 = smov 64   ;;  %vm9_vm1 = vcmask 1048320   ;;  %vm15_vm2 = vcmask 785920   ;;  %vm21_vm3 = vcmask 523520   ;;  %s94_s0 = inlined_call_operand.vmem [shape: f32[16,32], index: 0, kind: input, shape index: {}]   ;;  %s95_s1 = inlined_call_operand.vmem [shape: f32[1,512], index: 1, kind: output, shape index: {}]  }
   0x1   :  { %v48_v0 = vld [vmem:[%s94_s0 + $0x3] ss:$4 sm:$0xf]   ;;  %v49_v1 = vld [vmem:[%s94_s0 + $0x2] ss:$4 sm:$0xf]  }
   0x2   :  { %7 = vrot.lane.b32.xlu0 %v48_v0, %s57_s8  ;;  %v50_v2 = vld [vmem:[%s94_s0 + $0x1] ss:$4 sm:$0xf]   ;;  %v2_v3 = vld [vmem:[%s94_s0] ss:$4 sm:$0xf]  }
   0x3   :  { %s58_s0 = smov 32   ;;  %4 = vst.msk [vmem:[#allocation0] ss:$8 sm:$0xf] %vm3_vm0, %v2_v3  }
   0x4   :  { %19 = vrot.lane.b32.xlu1 %v50_v2, %s58_s0 }
   0x6   :  { %13 = vrot.lane.b32.xlu0 %v49_v1, %s59_s15 }
  0x74   :  { %v8_v4 = vpop.permute.xlu0 %7  }
  0x75   :  { %10 = vst.msk [vmem:[#allocation0] ss:$8 sm:$0xf] %vm9_vm1, %v8_v4  }
  0x76   :  { %v20_v5 = vpop.permute.xlu1 %19  }
  0x78   :  { %v14_v6 = vpop.permute.xlu0 %13  }
  0x79   :  { %16 = vst.msk [vmem:[#allocation0] ss:$8 sm:$0xf] %vm15_vm2, %v14_v6  }
  0x7a   :  { %22 = vst.msk [vmem:[#allocation0] ss:$8 sm:$0xf] %vm21_vm3, %v20_v5  }
  0x81   :  { %v26_v7 = vld [vmem:[#allocation0] sm:$0x1]  ;;  %v30_v8 = vld [vmem:[#allocation0 + $0x8] sm:$0x1]  ;;  %v35_v9 = vld [vmem:[#allocation0 + $0x10] sm:$0x1] }
  0x82   :  { %28 = vst [vmem:[%s95_s1] sm:$0x1] %v26_v7  ;;  %51 = vst [vmem:[%s95_s1 + $0x1] sm:$0x1] %v30_v8  ;;  %v41_v10 = vld [vmem:[#allocation0 + $0x18] sm:$0x1] }
  0x83   :  { %52 = vst [vmem:[%s95_s1 + $0x2] sm:$0x1] %v35_v9  ;;  %53 = vst [vmem:[%s95_s1 + $0x3] sm:$0x1] %v41_v10 }

// kernel: model_forward.1
= control target key start
LH: loop header
LB: loop body
LE: loop exit
PB: predicated region body
PF: predicated region fallthrough
CT: control target
= control target key end

     0   :  { %s1791_s12 = smov 0   ;;  %s2522_s0 = inlined_call_operand.vmem [shape: f32[2,20,80], index: 0, kind: input, shape index: {}]   ;;  %s2523_s1 = inlined_call_operand.vmem [shape: f32[5,80,512], index: 1, kind: input, shape index: {}]   ;;  %s2524_s2 = inlined_call_operand.vmem [shape: f32[1,512], index: 2, kind: input, shape index: {}]   ;;  %s2525_s3 = inlined_call_operand.vmem [shape: f32[2,16,512], index: 3, kind: output, shape index: {}]  }
   0x1 LB: > { %s1329_s13 = sadd.s32 4294967295, %s1768_s12   ;;  %p1333_p0 = scmp.ge.s32.totalorder %s1768_s12, 1  ;;  %s1768_s12 = sphi %s1791_s12, %s13_s12  }
   0x2   : > { %p137_p1 = scmp.lt.s32.totalorder %s1768_s12, 3 }
   0x4   : > { %p138_p2 = pnand %p1333_p0, %p137_p1 }
   0x5   : > { %v1338_v0 = vld [vmem:[%s2523_s1 + $0x148] sm:$0xff] (!%p138_p2)  ;;  %v1340_v2 = vld [vmem:[%s2523_s1 + $0x158] sm:$0xff] (!%p138_p2)  ;;  %p1808_p3 = scmp.lt.s32.totalorder (!%p138_p2), %s1329_s13, 1  ;;  %v1337_v5 = vld [vmem:[%s2523_s1 + $0x140] sm:$0xff] (!%p138_p2)  ;;  %v1770_v7 = vmov (!%p138_p2), 0.0   ;;  %vm258_vm0 = vcmask (!%p138_p2), 1046528  }
   0x6   : > { %141 = sbr.rel (%p138_p2) target bundleno = 334 (0x14e), region = 32  ;;  %v1342_v1 = vld [vmem:[%s2523_s1 + $0x168] sm:$0xff] (!%p138_p2)  ;;  %v1344_v4 = vld [vmem:[%s2523_s1 + $0x178] sm:$0xff] (!%p138_p2)  ;;  %v1341_v6 = vld [vmem:[%s2523_s1 + $0x160] sm:$0xff] (!%p138_p2)  ;;  %333 = vmatprep.mubr.f32.mxu0 (!%p138_p2), %v1770_v7  ;;  %410 = vmatprep.mubr.f32.mxu1 (!%p138_p2), %v1770_v7  ;;  %vm1048_vm1 = vcmask (!%p138_p2), 1043456   ;;  %vm264_vm2 = vcmask (!%p138_p2), 654336  }
   0x7   : > { %v1520_v3 = vpack.c.bf16 (!%p138_p2), %v1342_v1, %v1338_v0  ;;  %v1540_v8 = vpack.c.bf16 (!%p138_p2), %v1344_v4, %v1340_v2  ;;  %v1522_v9 = vpack.c.bf16 (!%p138_p2), %v1341_v6, %v1337_v5  ;;  %v1339_v10 = vld [vmem:[%s2523_s1 + $0x150] sm:$0xff] (!%p138_p2)  ;;  %v1346_v12 = vld [vmem:[%s2523_s1 + $0x188] sm:$0xff] (!%p138_p2)  ;;  %v1348_v15 = vld [vmem:[%s2523_s1 + $0x198] sm:$0xff] (!%p138_p2)  ;;  %vm622_vm3 = vcmask (!%p138_p2), 1045504  }
   0x8   : > { %v1343_v11 = vld [vmem:[%s2523_s1 + $0x170] sm:$0xff] (!%p138_p2)  ;;  %v1350_v14 = vld [vmem:[%s2523_s1 + $0x1a8] sm:$0xff] (!%p138_p2)  ;;  %v1352_v16 = vld [vmem:[%s2523_s1 + $0x1b8] sm:$0xff] (!%p138_p2)  ;;  %vm835_vm4 = vcmask (!%p138_p2), 1044480  }
   0x9   : > { %1521 = vmatprep.subr.bf16.mxu0 (!%p138_p2), %v1520_v3  ;;  %v1542_v13 = vpack.c.bf16 (!%p138_p2), %v1343_v11, %v1339_v10  ;;  %1541 = vmatprep.subr.bf16.mxu1 (!%p138_p2), %v1540_v8  ;;  %v1524_v17 = vpack.c.bf16 (!%p138_p2), %v1350_v14, %v1346_v12  ;;  %v1544_v18 = vpack.c.bf16 (!%p138_p2), %v1352_v16, %v1348_v15  ;;  %v1345_v19 = vld [vmem:[%s2523_s1 + $0x180] sm:$0xff] (!%p138_p2)  ;;  %v1347_v21 = vld [vmem:[%s2523_s1 + $0x190] sm:$0xff] (!%p138_p2)  ;;  %v1354_v24 = vld [vmem:[%s2523_s1 + $0x1c8] sm:$0xff] (!%p138_p2) }
   0xa   : > { %1523 = vmatpush1.bf16.msra.mxu0 (!%p138_p2), %v1522_v9  ;;  %v1349_v20 = vld [vmem:[%s2523_s1 + $0x1a0] sm:$0xff] (!%p138_p2)  ;;  %v1351_v23 = vld [vmem:[%s2523_s1 + $0x1b0] sm:$0xff] (!%p138_p2)  ;;  %v1358_v25 = vld [vmem:[%s2523_s1 + $0x1e8] sm:$0xff] (!%p138_p2) }
   0xb   : > { %1543 = vmatpush1.bf16.msra.mxu1 (!%p138_p2), %v1542_v13  ;;  %v1526_v22 = vpack.c.bf16 (!%p138_p2), %v1349_v20, %v1345_v19  ;;  %1525 = vmatprep.subr.bf16.mxu0 (!%p138_p2), %v1524_v17  ;;  %v1546_v26 = vpack.c.bf16 (!%p138_p2), %v1351_v23, %v1347_v21  ;;  %v1528_v27 = vpack.c.bf16 (!%p138_p2), %v1358_v25, %v1354_v24  ;;  %v1356_v28 = vld [vmem:[%s2523_s1 + $0x1d8] sm:$0xff] (!%p138_p2)  ;;  %v1353_v30 = vld [vmem:[%s2523_s1 + $0x1c0] sm:$0xff] (!%p138_p2)  ;;  %v1355_v33 = vld [vmem:[%s2523_s1 + $0x1d0] sm:$0xff] (!%p138_p2) }
   0xc   : > { %1545 = vmatprep.subr.bf16.mxu1 (!%p138_p2), %v1544_v18  ;;  %v1360_v29 = vld [vmem:[%s2523_s1 + $0x1f8] sm:$0xff] (!%p138_p2)  ;;  %v1357_v32 = vld [vmem:[%s2523_s1 + $0x1e0] sm:$0xff] (!%p138_p2)  ;;  %v1359_v34 = vld [vmem:[%s2523_s1 + $0x1f0] sm:$0xff] (!%p138_p2) }
   0xd   : > { %s2528_s13 = smov (!%p1808_p3, %s1329_s13), 1  ;;  %v1548_v31 = vpack.c.bf16 %v1360_v29, %v1356_v28  ;;  %v1530_v35 = vpack.c.bf16 %v1357_v32, %v1353_v30  ;;  %v1362_v36 = vld [vmem:[%s2523_s1 + $0x208] sm:$0xff]  ;;  %v1364_v38 = vld [vmem:[%s2523_s1 + $0x218] sm:$0xff]  ;;  %v1550_v39 = vpack.c.bf16 %v1359_v34, %v1355_v33  ;;  %v1361_v42 = vld [vmem:[%s2523_s1 + $0x200] sm:$0xff] }
   0xe   : > { %s1752_s11 = smul.u32 24, %s2528_s13  ;;  %1527 = vmatpush1.bf16.msra.mxu0 %v1526_v22  ;;  %v1366_v37 = vld [vmem:[%s2523_s1 + $0x228] sm:$0xff]  ;;  %v1368_v41 = vld [vmem:[%s2523_s1 + $0x238] sm:$0xff]  ;;  %v1365_v43 = vld [vmem:[%s2523_s1 + $0x220] sm:$0xff]  ;;  %s1519_s23 = sshll.u32 %s2528_s13, 6 }
   0xf   : > { %1547 = vmatpush1.bf16.msra.mxu1 %v1546_v26  ;;  %1529 = vmatprep.subr.bf16.mxu0 %v1528_v27  ;;  %v1532_v40 = vpack.c.bf16 %v1366_v37, %v1362_v36  ;;  %v1552_v44 = vpack.c.bf16 %v1368_v41, %v1364_v38  ;;  %v1363_v45 = vld [vmem:[%s2523_s1 + $0x210] sm:$0xff]  ;;  %v1370_v47 = vld [vmem:[%s2523_s1 + $0x248] sm:$0xff]  ;;  %v1372_v49 = vld [vmem:[%s2523_s1 + $0x258] sm:$0xff]  ;;  %v1534_v51 = vpack.c.bf16 %v1365_v43, %v1361_v42  ;;  %s2509_s26 = scalar_lea.vmem %s2525_s3, %s1519_s23 }
  0x10   : > { %1549 = vmatprep.subr.bf16.mxu1 %v1548_v31  ;;  %v1367_v46 = vld [vmem:[%s2523_s1 + $0x230] sm:$0xff]  ;;  %v1374_v48 = vld [vmem:[%s2523_s1 + $0x268] sm:$0xff]  ;;  %v1376_v50 = vld [vmem:[%s2523_s1 + $0x278] sm:$0xff]  ;;  %s1921_s16 = scalar_lea.vmem %s2522_s0, %s1752_s11 }
  0x11   : > { %v1369_v52 = vld [vmem:[%s2523_s1 + $0x240] sm:$0xff]  ;;  %v1554_v53 = vpack.c.bf16 %v1367_v46, %v1363_v45  ;;  %v1536_v54 = vpack.c.bf16 %v1374_v48, %v1370_v47  ;;  %v1371_v56 = vld [vmem:[%s2523_s1 + $0x250] sm:$0xff]  ;;  %v1556_v58 = vpack.c.bf16 %v1376_v50, %v1372_v49  ;;  %v175_v59 = vld [vmem:[%s2523_s1 + $0x8] sm:$0xff] }
  0x12   : > { %1531 = vmatpush1.bf16.msra.mxu0 %v1530_v35  ;;  %v1373_v55 = vld [vmem:[%s2523_s1 + $0x260] sm:$0xff]  ;;  %v1375_v57 = vld [vmem:[%s2523_s1 + $0x270] sm:$0xff]  ;;  %v179_v60 = vld [vmem:[%s2523_s1 + $0x28] sm:$0xff] }
  0x13   : > { %1551 = vmatpush1.bf16.msra.mxu1 %v1550_v39  ;;  %1533 = vmatprep.subr.bf16.mxu0 %v1532_v40  ;;  %v1942_v61 = vld [vmem:[%s1921_s16] sm:$0xff]  ;;  %v177_v62 = vld [vmem:[%s2523_s1 + $0x18] sm:$0xff]  ;;  %v1951_v0 = vld [vmem:[%s1921_s16 + $0x8] sm:$0xff]  ;;  %v1538_v1 = vpack.c.bf16 %v1373_v55, %v1369_v52  ;;  %v1558_v4 = vpack.c.bf16 %v1375_v57, %v1371_v56  ;;  %v1560_v5 = vpack.c.bf16 %v179_v60, %v175_v59 }
  0x14   : > { %1553 = vmatprep.subr.bf16.mxu1 %v1552_v44  ;;  %v181_v63 = vld [vmem:[%s2523_s1 + $0x38] sm:$0xff]  ;;  %v259_v2 = vrot.slane %v1942_v61, 1  ;;  %v260_v3 = vrot.slane %v1951_v0, 1  ;;  %v174_v6 = vld [vmem:[%s2523_s1] sm:$0xff]  ;;  %v176_v9 = vld [vmem:[%s2523_s1 + $0x10] sm:$0xff]  ;;  %v1049_v10 = vrot.slane %v1942_v61, 4 }
  0x15   : > { %v178_v8 = vld [vmem:[%s2523_s1 + $0x20] sm:$0xff]  ;;  %v1050_v11 = vrot.slane %v1951_v0, 4  ;;  %v1580_v12 = vpack.c.bf16 %v181_v63, %v177_v62  ;;  %v180_v13 = vld [vmem:[%s2523_s1 + $0x30] sm:$0xff]  ;;  %v183_v14 = vld [vmem:[%s2523_s1 + $0x48] sm:$0xff] }
  0x16   : > { %1535 = vmatpush1.bf16.msra.mxu0 %v1534_v51  ;;  %v187_v15 = vld [vmem:[%s2523_s1 + $0x68] sm:$0xff]  ;;  %v185_v16 = vld [vmem:[%s2523_s1 + $0x58] sm:$0xff]  ;;  %v261_v19 = vsel %vm258_vm0, %v259_v2, %v260_v3  ;;  %v1562_v20 = vpack.c.bf16 %v178_v8, %v174_v6  ;;  %v1582_v21 = vpack.c.bf16 %v180_v13, %v176_v9  ;;  %v182_v23 = vld [vmem:[%s2523_s1 + $0x40] sm:$0xff] }
  0x17   : > { %1555 = vmatpush1.bf16.msra.mxu1 %v1554_v53  ;;  %1537 = vmatprep.subr.bf16.mxu0 %v1536_v54  ;;  %v189_v17 = vld [vmem:[%s2523_s1 + $0x78] sm:$0xff]  ;;  %v1984_v18 = vsel %vm1048_vm1, %v1049_v10, %v1050_v11  ;;  %v1564_v22 = vpack.c.bf16 %v187_v15, %v183_v14  ;;  %v186_v24 = vld [vmem:[%s2523_s1 + $0x60] sm:$0xff]  ;;  %v184_v25 = vld [vmem:[%s2523_s1 + $0x50] sm:$0xff] }
  0x18   : > { %1557 = vmatprep.subr.bf16.mxu1 %v1556_v58  ;;  %v1584_v26 = vpack.c.bf16 %v189_v17, %v185_v16  ;;  %v188_v27 = vld [vmem:[%s2523_s1 + $0x70] sm:$0xff]  ;;  %v191_v28 = vld [vmem:[%s2523_s1 + $0x88] sm:$0xff]  ;;  %v193_v30 = vld [vmem:[%s2523_s1 + $0x98] sm:$0xff]  ;;  %v1566_v32 = vpack.c.bf16 %v186_v24, %v182_v23 }
  0x19   : > { %v195_v29 = vld [vmem:[%s2523_s1 + $0xa8] sm:$0xff]  ;;  %v197_v31 = vld [vmem:[%s2523_s1 + $0xb8] sm:$0xff]  ;;  %v190_v33 = vld [vmem:[%s2523_s1 + $0x80] sm:$0xff]  ;;  %v1586_v34 = vpack.c.bf16 %v188_v27, %v184_v25 }
  0x1a   : > { %1539 = vmatpush1.bf16.msra.mxu0 %v1538_v1  ;;  %v1568_v35 = vpack.c.bf16 %v195_v29, %v191_v28  ;;  %v194_v36 = vld [vmem:[%s2523_s1 + $0xa0] sm:$0xff]  ;;  %v192_v37 = vld [vmem:[%s2523_s1 + $0x90] sm:$0xff]  ;;  %v1588_v39 = vpack.c.bf16 %v197_v31, %v193_v30  ;;  %v199_v40 = vld [vmem:[%s2523_s1 + $0xc8] sm:$0xff] }
  0x1b   : > { %1559 = vmatpush1.bf16.msra.mxu1 %v1558_v4  ;;  %1561 = vmatprep.subr.bf16.mxu0 %v1560_v5  ;;  %v196_v38 = vld [vmem:[%s2523_s1 + $0xb0] sm:$0xff]  ;;  %v203_v41 = vld [vmem:[%s2523_s1 + $0xe8] sm:$0xff]  ;;  %v201_v43 = vld [vmem:[%s2523_s1 + $0xd8] sm:$0xff]  ;;  %v1570_v46 = vpack.c.bf16 %v194_v36, %v190_v33 }
  0x1c   : > { %1581 = vmatprep.subr.bf16.mxu1 %v1580_v12  ;;  %v2035_v42 = vld [vmem:[%s1921_s16 + $0x10] sm:$0xf]  ;;  %v205_v44 = vld [vmem:[%s2523_s1 + $0xf8] sm:$0xff]  ;;  %v1590_v48 = vpack.c.bf16 %v196_v38, %v192_v37  ;;  %v1572_v49 = vpack.c.bf16 %v203_v41, %v199_v40  ;;  %v198_v50 = vld [vmem:[%s2523_s1 + $0xc0] sm:$0xff] }
  0x1d   : > { %1377 = vmatmul.mubr.msk.f32.vlgmr.msra.gmra.mrb[0].mxu0 %vm264_vm2, %v261_v19  ;;  %v262_v45 = vrot.slane %v2035_v42, 1  ;;  %v1052_v47 = vrot.slane %v2035_v42, 4  ;;  %v202_v51 = vld [vmem:[%s2523_s1 + $0xe0] sm:$0xff]  ;;  %v200_v52 = vld [vmem:[%s2523_s1 + $0xd0] sm:$0xff]  ;;  %v1592_v54 = vpack.c.bf16 %v205_v44, %v201_v43  ;;  %v207_v56 = vld [vmem:[%s2523_s1 + $0x108] sm:$0xff] }
  0x1e   : > { %1379 = vmatmul.mubr.msk.f32.vlgmr.msra.gmra.mrb[0].mxu1 %vm264_vm2, %v261_v19  ;;  %1563 = vmatpush1.bf16.msra.mxu0 %v1562_v20  ;;  %v204_v55 = vld [vmem:[%s2523_s1 + $0xf0] sm:$0xff]  ;;  %v211_v57 = vld [vmem:[%s2523_s1 + $0x128] sm:$0xff]  ;;  %v209_v58 = vld [vmem:[%s2523_s1 + $0x118] sm:$0xff]  ;;  %v1574_v62 = vpack.c.bf16 %v202_v51, %v198_v50 }
  0x1f   : > { %1583 = vmatpush1.bf16.msra.mxu1 %v1582_v21  ;;  %1565 = vmatprep.subr.bf16.mxu0 %v1564_v22  ;;  %v263_v53 = vsel %vm258_vm0, %v260_v3, %v262_v45  ;;  %v213_v59 = vld [vmem:[%s2523_s1 + $0x138] sm:$0xff]  ;;  %v2079_v60 = vsel %vm1048_vm1, %v1050_v11, %v1052_v47  ;;  %v1594_v63 = vpack.c.bf16 %v204_v55, %v200_v52  ;;  %v206_v2 = vld [vmem:[%s2523_s1 + $0x100] sm:$0xff]  ;;  %v208_v4 = vld [vmem:[%s2523_s1 + $0x110] sm:$0xff] }
  0x20   : > { %1585 = vmatprep.subr.bf16.mxu1 %v1584_v26  ;;  %339 = vmatprep.mubr.f32.mxu0 %v1770_v7  ;;  %v1576_v1 = vpack.c.bf16 %v211_v57, %v207_v56  ;;  %v210_v3 = vld [vmem:[%s2523_s1 + $0x120] sm:$0xff]  ;;  %v1596_v5 = vpack.c.bf16 %v213_v59, %v209_v58  ;;  %v212_v6 = vld [vmem:[%s2523_s1 + $0x130] sm:$0xff]  ;;  %v1386_v8 = vld [vmem:[%s2523_s1 + $0x288] sm:$0xff] }
  0x21   : > { %416 = vmatprep.mubr.f32.mxu1 %v1770_v7  ;;  %1378 = vmatmul.mubr.msk.f32.gmra.mrb[2].mxu0 %vm264_vm2, %v263_v53  ;;  %v1390_v9 = vld [vmem:[%s2523_s1 + $0x2a8] sm:$0xff]  ;;  %v1388_v10 = vld [vmem:[%s2523_s1 + $0x298] sm:$0xff]  ;;  %v1578_v12 = vpack.c.bf16 %v210_v3, %v206_v2  ;;  %v1598_v13 = vpack.c.bf16 %v212_v6, %v208_v4  ;;  %v1385_v15 = vld [vmem:[%s2523_s1 + $0x280] sm:$0xff] }
  0x22   : > { %1567 = vmatpush1.bf16.msra.mxu0 %v1566_v32  ;;  %1380 = vmatmul.mubr.msk.f32.gmra.mrb[2].mxu1 %vm264_vm2, %v263_v53  ;;  %v1392_v11 = vld [vmem:[%s2523_s1 + $0x2b8] sm:$0xff]  ;;  %v1600_v14 = vpack.c.bf16 %v1390_v9, %v1386_v8  ;;  %v1389_v16 = vld [vmem:[%s2523_s1 + $0x2a0] sm:$0xff]  ;;  %v1387_v17 = vld [vmem:[%s2523_s1 + $0x290] sm:$0xff] }
  0x23   : > { %1587 = vmatpush1.bf16.msra.mxu1 %v1586_v34  ;;  %1569 = vmatprep.subr.bf16.mxu0 %v1568_v35  ;;  %v1620_v19 = vpack.c.bf16 %v1392_v11, %v1388_v10  ;;  %v1391_v20 = vld [vmem:[%s2523_s1 + $0x2b0] sm:$0xff]  ;;  %v1394_v21 = vld [vmem:[%s2523_s1 + $0x2c8] sm:$0xff]  ;;  %v1396_v23 = vld [vmem:[%s2523_s1 + $0x2d8] sm:$0xff]  ;;  %v1602_v25 = vpack.c.bf16 %v1389_v16, %v1385_v15  ;;  %v623_v15 = vrot.slane %v1942_v61, 2  ;;  %v624_v16 = vrot.slane %v1951_v0, 2 }
  0x24   : > { %1589 = vmatprep.subr.bf16.mxu1 %v1588_v39  ;;  %491 = vmatprep.mubr.f32.mxu0 %v1770_v7  ;;  %v1398_v22 = vld [vmem:[%s2523_s1 + $0x2e8] sm:$0xff]  ;;  %v1400_v24 = vld [vmem:[%s2523_s1 + $0x2f8] sm:$0xff]  ;;  %v1622_v26 = vpack.c.bf16 %v1391_v20, %v1387_v17  ;;  %v1393_v28 = vld [vmem:[%s2523_s1 + $0x2c0] sm:$0xff] }
  0x25   : > { %568 = vmatprep.mubr.f32.mxu1 %v1770_v7  ;;  %v1604_v27 = vpack.c.bf16 %v1398_v22, %v1394_v21  ;;  %v1397_v29 = vld [vmem:[%s2523_s1 + $0x2e0] sm:$0xff]  ;;  %v1395_v30 = vld [vmem:[%s2523_s1 + $0x2d0] sm:$0xff]  ;;  %v1624_v31 = vpack.c.bf16 %v1400_v24, %v1396_v23  ;;  %v1402_v33 = vld [vmem:[%s2523_s1 + $0x308] sm:$0xff] }
  0x26   : > { %1571 = vmatpush1.bf16.msra.mxu0 %v1570_v46  ;;  %v1399_v32 = vld [vmem:[%s2523_s1 + $0x2f0] sm:$0xff]  ;;  %v1406_v34 = vld [vmem:[%s2523_s1 + $0x328] sm:$0xff]  ;;  %v1404_v35 = vld [vmem:[%s2523_s1 + $0x318] sm:$0xff]  ;;  %v1606_v37 = vpack.c.bf16 %v1397_v29, %v1393_v28  ;;  %v625_v29 = vsel %vm622_vm3, %v623_v15, %v624_v16 }
  0x27   : > { %1591 = vmatpush1.bf16.msra.mxu1 %v1590_v48  ;;  %1573 = vmatprep.subr.bf16.mxu0 %v1572_v49  ;;  %v1408_v36 = vld [vmem:[%s2523_s1 + $0x338] sm:$0xff]  ;;  %v1626_v38 = vpack.c.bf16 %v1399_v32, %v1395_v30  ;;  %v1608_v39 = vpack.c.bf16 %v1406_v34, %v1402_v33  ;;  %v1401_v40 = vld [vmem:[%s2523_s1 + $0x300] sm:$0xff]  ;;  %v1403_v43 = vld [vmem:[%s2523_s1 + $0x310] sm:$0xff] }
  0x28   : > { %1593 = vmatprep.subr.bf16.mxu1 %v1592_v54  ;;  %v1405_v41 = vld [vmem:[%s2523_s1 + $0x320] sm:$0xff]  ;;  %v1628_v44 = vpack.c.bf16 %v1408_v36, %v1404_v35  ;;  %v1407_v45 = vld [vmem:[%s2523_s1 + $0x330] sm:$0xff]  ;;  %v1410_v46 = vld [vmem:[%s2523_s1 + $0x348] sm:$0xff] }
  0x29   : > { %v1414_v47 = vld [vmem:[%s2523_s1 + $0x368] sm:$0xff]  ;;  %v1412_v48 = vld [vmem:[%s2523_s1 + $0x358] sm:$0xff]  ;;  %v1610_v50 = vpack.c.bf16 %v1405_v41, %v1401_v40  ;;  %v1630_v51 = vpack.c.bf16 %v1407_v45, %v1403_v43  ;;  %v1409_v53 = vld [vmem:[%s2523_s1 + $0x340] sm:$0xff] }
  0x2a   : > { %1575 = vmatpush1.bf16.msra.mxu0 %v1574_v62  ;;  %v1416_v49 = vld [vmem:[%s2523_s1 + $0x378] sm:$0xff]  ;;  %v1612_v52 = vpack.c.bf16 %v1414_v47, %v1410_v46  ;;  %v1413_v54 = vld [vmem:[%s2523_s1 + $0x360] sm:$0xff]  ;;  %v1411_v55 = vld [vmem:[%s2523_s1 + $0x350] sm:$0xff] }
  0x2b   : > { %1595 = vmatpush1.bf16.msra.mxu1 %v1594_v63  ;;  %1577 = vmatprep.subr.bf16.mxu0 %v1576_v1  ;;  %v1632_v56 = vpack.c.bf16 %v1416_v49, %v1412_v48  ;;  %v1415_v57 = vld [vmem:[%s2523_s1 + $0x370] sm:$0xff]  ;;  %v1418_v58 = vld [vmem:[%s2523_s1 + $0x388] sm:$0xff]  ;;  %v1420_v62 = vld [vmem:[%s2523_s1 + $0x398] sm:$0xff]  ;;  %v1614_v1 = vpack.c.bf16 %v1413_v54, %v1409_v53 }
  0x2c   : > { %1597 = vmatprep.subr.bf16.mxu1 %v1596_v5  ;;  %v1422_v59 = vld [vmem:[%s2523_s1 + $0x3a8] sm:$0xff]  ;;  %v1424_v63 = vld [vmem:[%s2523_s1 + $0x3b8] sm:$0xff]  ;;  %v1634_v2 = vpack.c.bf16 %v1415_v57, %v1411_v55  ;;  %v1417_v4 = vld [vmem:[%s2523_s1 + $0x380] sm:$0xff] }
  0x2d   : > { %v1616_v3 = vpack.c.bf16 %v1422_v59, %v1418_v58  ;;  %v1421_v5 = vld [vmem:[%s2523_s1 + $0x3a0] sm:$0xff]  ;;  %v1419_v6 = vld [vmem:[%s2523_s1 + $0x390] sm:$0xff]  ;;  %v1636_v8 = vpack.c.bf16 %v1424_v63, %v1420_v62  ;;  %v1430_v10 = vld [vmem:[%s2523_s1 + $0x3c8] sm:$0xff] }
  0x2e   : > { %1579 = vmatpush1.bf16.msra.mxu0 %v1578_v12  ;;  %v1423_v9 = vld [vmem:[%s2523_s1 + $0x3b0] sm:$0xff]  ;;  %v1434_v11 = vld [vmem:[%s2523_s1 + $0x3e8] sm:$0xff]  ;;  %v1432_v12 = vld [vmem:[%s2523_s1 + $0x3d8] sm:$0xff] }
  0x2f   : > { %1599 = vmatpush1.bf16.msra.mxu1 %v1598_v13  ;;  %1601 = vmatprep.subr.bf16.mxu0 %v1600_v14  ;;  %v1436_v13 = vld [vmem:[%s2523_s1 + $0x3f8] sm:$0xff]  ;;  %v1618_v14 = vpack.c.bf16 %v1421_v5, %v1417_v4  ;;  %v1638_v17 = vpack.c.bf16 %v1423_v9, %v1419_v6  ;;  %v1429_v20 = vld [vmem:[%s2523_s1 + $0x3c0] sm:$0xff]  ;;  %v1431_v22 = vld [vmem:[%s2523_s1 + $0x3d0] sm:$0xff] }
  0x30   : > { %1621 = vmatprep.subr.bf16.mxu1 %v1620_v19  ;;  %v1640_v19 = vpack.c.bf16 %v1434_v11, %v1430_v10  ;;  %v1433_v21 = vld [vmem:[%s2523_s1 + $0x3e0] sm:$0xff]  ;;  %v1660_v23 = vpack.c.bf16 %v1436_v13, %v1432_v12  ;;  %v1435_v24 = vld [vmem:[%s2523_s1 + $0x3f0] sm:$0xff]  ;;  %v1444_v28 = vld [vmem:[%s2523_s1 + $0x438] sm:$0xff] }
  0x31   : > { %1381 = vmatmul.mubr.msk.f32.vlgmr.msra.gmra.mrb[0].mxu0 %vm264_vm2, %v1942_v61  ;;  %v1642_v30 = vpack.c.bf16 %v1433_v21, %v1429_v20  ;;  %v1662_v32 = vpack.c.bf16 %v1435_v24, %v1431_v22  ;;  %v1437_v34 = vld [vmem:[%s2523_s1 + $0x400] sm:$0xff]  ;;  %v1439_v36 = vld [vmem:[%s2523_s1 + $0x410] sm:$0xff]  ;;  %v1450_v40 = vld [vmem:[%s2523_s1 + $0x468] sm:$0xff]  ;;  %v837_v24 = vrot.slane %v1951_v0, 3 }
  0x32   : > { %1383 = vmatmul.mubr.msk.f32.vlgmr.msra.gmra.mrb[0].mxu1 %vm264_vm2, %v1942_v61  ;;  %1603 = vmatpush1.bf16.msra.mxu0 %v1602_v25  ;;  %v1438_v25 = vld [vmem:[%s2523_s1 + $0x408] sm:$0xff]  ;;  %v1441_v35 = vld [vmem:[%s2523_s1 + $0x420] sm:$0xff]  ;;  %v1448_v41 = vld [vmem:[%s2523_s1 + $0x458] sm:$0xff] }
  0x33   : > { %1623 = vmatpush1.bf16.msra.mxu1 %v1622_v26  ;;  %1605 = vmatprep.subr.bf16.mxu0 %v1604_v27  ;;  %v1442_v26 = vld [vmem:[%s2523_s1 + $0x428] sm:$0xff]  ;;  %v1440_v27 = vld [vmem:[%s2523_s1 + $0x418] sm:$0xff]  ;;  %v1445_v48 = vld [vmem:[%s2523_s1 + $0x440] sm:$0xff] }
  0x34   : > { %1625 = vmatprep.subr.bf16.mxu1 %v1624_v31  ;;  %497 = vmatprep.mubr.f32.mxu0 %v1770_v7  ;;  %v626_v31 = vrot.slane %v2035_v42, 2  ;;  %v1644_v33 = vpack.c.bf16 %v1442_v26, %v1438_v25  ;;  %v1452_v43 = vld [vmem:[%s2523_s1 + $0x478] sm:$0xff]  ;;  %v1449_v49 = vld [vmem:[%s2523_s1 + $0x460] sm:$0xff]  ;;  %v1454_v53 = vld [vmem:[%s2523_s1 + $0x488] sm:$0xff] }
  0x35   : > { %574 = vmatprep.mubr.f32.mxu1 %v1770_v7  ;;  %1382 = vmatmul.mubr.msk.f32.gmra.mrb[2].mxu0 %vm264_vm2, %v1951_v0  ;;  %v1458_v54 = vld [vmem:[%s2523_s1 + $0x4a8] sm:$0xff]  ;;  %v1456_v55 = vld [vmem:[%s2523_s1 + $0x498] sm:$0xff]  ;;  %v1650_v57 = vpack.c.bf16 %v1449_v49, %v1445_v48  ;;  %v1453_v62 = vld [vmem:[%s2523_s1 + $0x480] sm:$0xff] }
  0x36   : > { %1607 = vmatpush1.bf16.msra.mxu0 %v1606_v37  ;;  %1384 = vmatmul.mubr.msk.f32.gmra.mrb[2].mxu1 %vm264_vm2, %v1951_v0  ;;  %v1664_v37 = vpack.c.bf16 %v1444_v28, %v1440_v27  ;;  %v627_v45 = vsel %vm622_vm3, %v624_v16, %v626_v31  ;;  %v1652_v59 = vpack.c.bf16 %v1458_v54, %v1454_v53  ;;  %v1457_v63 = vld [vmem:[%s2523_s1 + $0x4a0] sm:$0xff]  ;;  %v1462_v4 = vld [vmem:[%s2523_s1 + $0x4c8] sm:$0xff]  ;;  %v1464_v6 = vld [vmem:[%s2523_s1 + $0x4d8] sm:$0xff] }
  0x37   : > { %1627 = vmatpush1.bf16.msra.mxu1 %v1626_v38  ;;  %1609 = vmatprep.subr.bf16.mxu0 %v1608_v39  ;;  %v1443_v38 = vld [vmem:[%s2523_s1 + $0x430] sm:$0xff]  ;;  %v1446_v39 = vld [vmem:[%s2523_s1 + $0x448] sm:$0xff]  ;;  %v1654_v9 = vpack.c.bf16 %v1457_v63, %v1453_v62  ;;  %v1461_v12 = vld [vmem:[%s2523_s1 + $0x4c0] sm:$0xff] }
  0x38   : > { %1629 = vmatprep.subr.bf16.mxu1 %v1628_v44  ;;  %696 = vmatprep.mubr.f32.mxu0 %v1770_v7  ;;  %v1646_v44 = vpack.c.bf16 %v1441_v35, %v1437_v34  ;;  %v1666_v46 = vpack.c.bf16 %v1443_v38, %v1439_v36  ;;  %v1648_v47 = vpack.c.bf16 %v1450_v40, %v1446_v39  ;;  %v1466_v5 = vld [vmem:[%s2523_s1 + $0x4e8] sm:$0xff]  ;;  %v1465_v13 = vld [vmem:[%s2523_s1 + $0x4e0] sm:$0xff]  ;;  %v1467_v16 = vld [vmem:[%s2523_s1 + $0x4f0] sm:$0xff]  ;;  %v839_v36 = vrot.slane %v2035_v42, 3 }
  0x39   : > { %773 = vmatprep.mubr.f32.mxu1 %v1770_v7  ;;  %v1656_v11 = vpack.c.bf16 %v1466_v5, %v1462_v4  ;;  %v1476_v20 = vld [vmem:[%s2523_s1 + $0x518] sm:$0xff]  ;;  %v1658_v22 = vpack.c.bf16 %v1465_v13, %v1461_v12  ;;  %v1473_v27 = vld [vmem:[%s2523_s1 + $0x500] sm:$0xff]  ;;  %v1479_v0 = vld [vmem:[%s2523_s1 + $0x530] sm:$0xff] }
  0x3a   : > { %1611 = vmatpush1.bf16.msra.mxu0 %v1610_v50  ;;  %v1447_v50 = vld [vmem:[%s2523_s1 + $0x450] sm:$0xff]  ;;  %v1480_v21 = vld [vmem:[%s2523_s1 + $0x538] sm:$0xff]  ;;  %v1477_v28 = vld [vmem:[%s2523_s1 + $0x520] sm:$0xff]  ;;  %v840_v49 = vsel %vm835_vm4, %v837_v24, %v839_v36 }
  0x3b   : > { %1631 = vmatpush1.bf16.msra.mxu1 %v1630_v51  ;;  %1613 = vmatprep.subr.bf16.mxu0 %v1612_v52  ;;  %v1668_v51 = vpack.c.bf16 %v1452_v43, %v1448_v41  ;;  %v1451_v52 = vld [vmem:[%s2523_s1 + $0x470] sm:$0xff]  ;;  %v1486_v31 = vld [vmem:[%s2523_s1 + $0x568] sm:$0xff]  ;;  %v1682_v35 = vpack.c.bf16 %v1477_v28, %v1473_v27  ;;  %v1481_v39 = vld [vmem:[%s2523_s1 + $0x540] sm:$0xff] }
  0x3c   : > { %1633 = vmatprep.subr.bf16.mxu1 %v1632_v56  ;;  %v1460_v56 = vld [vmem:[%s2523_s1 + $0x4b8] sm:$0xff]  ;;  %v1670_v58 = vpack.c.bf16 %v1451_v52, %v1447_v50  ;;  %v1485_v40 = vld [vmem:[%s2523_s1 + $0x560] sm:$0xff]  ;;  %v1483_v41 = vld [vmem:[%s2523_s1 + $0x550] sm:$0xff] }
  0x3d   : > { %v1487_v42 = vld [vmem:[%s2523_s1 + $0x570] sm:$0xff]  ;;  %v1686_v48 = vpack.c.bf16 %v1485_v40, %v1481_v39  ;;  %v1489_v52 = vld [vmem:[%s2523_s1 + $0x580] sm:$0xff]  ;;  %v1504_v62 = vld [vmem:[%s2523_s1 + $0x5f8] sm:$0xff] }
  0x3e   : > { %1615 = vmatpush1.bf16.msra.mxu0 %v1614_v1  ;;  %v1455_v1 = vld [vmem:[%s2523_s1 + $0x490] sm:$0xff]  ;;  %v1706_v50 = vpack.c.bf16 %v1487_v42, %v1483_v41  ;;  %v1493_v53 = vld [vmem:[%s2523_s1 + $0x5a0] sm:$0xff]  ;;  %v1512_v12 = vld [vmem:[%s2523_s1 + $0x638] sm:$0xff] }
  0x3f   : > { %1635 = vmatpush1.bf16.msra.mxu1 %v1634_v2  ;;  %1617 = vmatprep.subr.bf16.mxu0 %v1616_v3  ;;  %v1672_v2 = vpack.c.bf16 %v1460_v56, %v1456_v55  ;;  %v1459_v3 = vld [vmem:[%s2523_s1 + $0x4b0] sm:$0xff]  ;;  %v1690_v63 = vpack.c.bf16 %v1493_v53, %v1489_v52  ;;  %v1501_v4 = vld [vmem:[%s2523_s1 + $0x5e0] sm:$0xff] }
  0x40   : > { %1637 = vmatprep.subr.bf16.mxu1 %v1636_v8  ;;  %v1468_v8 = vld [vmem:[%s2523_s1 + $0x4f8] sm:$0xff]  ;;  %v1674_v10 = vpack.c.bf16 %v1459_v3, %v1455_v1  ;;  %v1491_v54 = vld [vmem:[%s2523_s1 + $0x590] sm:$0xff]  ;;  %v1497_v3 = vld [vmem:[%s2523_s1 + $0x5c0] sm:$0xff] }
  0x41   : > { %v1676_v15 = vpack.c.bf16 %v1468_v8, %v1464_v6  ;;  %v1495_v56 = vld [vmem:[%s2523_s1 + $0x5b0] sm:$0xff]  ;;  %v1694_v13 = vpack.c.bf16 %v1501_v4, %v1497_v3  ;;  %v1220_v27 = vld [vmem:[%s2524_s2] sm:$0xf] }
  0x42   : > { %1619 = vmatpush1.bf16.msra.mxu0 %v1618_v14  ;;  %v1463_v14 = vld [vmem:[%s2523_s1 + $0x4d0] sm:$0xff]  ;;  %v1710_v1 = vpack.c.bf16 %v1495_v56, %v1491_v54 }
  0x43   : > { %1639 = vmatpush1.bf16.msra.mxu1 %v1638_v17  ;;  %1641 = vmatprep.subr.bf16.mxu0 %v1640_v19  ;;  %v1474_v17 = vld [vmem:[%s2523_s1 + $0x508] sm:$0xff]  ;;  %v1678_v25 = vpack.c.bf16 %v1467_v16, %v1463_v14  ;;  %v1499_v5 = vld [vmem:[%s2523_s1 + $0x5d0] sm:$0xff]  ;;  %v1505_v16 = vld [vmem:[%s2523_s1 + $0x600] sm:$0xff] }
  0x44   : > { %1661 = vmatprep.subr.bf16.mxu1 %v1660_v23  ;;  %v1478_v19 = vld [vmem:[%s2523_s1 + $0x528] sm:$0xff]  ;;  %v836_v23 = vrot.slane %v1942_v61, 3  ;;  %v1700_v61 = vpack.c.bf16 %v1480_v21, %v1476_v20  ;;  %v1503_v8 = vld [vmem:[%s2523_s1 + $0x5f0] sm:$0xff] }
  0x45   : > { %1425 = vmatmul.mubr.msk.f32.vlgmr.msra.gmra.mrb[0].mxu0 %vm264_vm2, %v625_v29  ;;  %v1680_v26 = vpack.c.bf16 %v1478_v19, %v1474_v17  ;;  %v1714_v14 = vpack.c.bf16 %v1503_v8, %v1499_v5  ;;  %v1509_v17 = vld [vmem:[%s2523_s1 + $0x620] sm:$0xff]  ;;  %v1507_v20 = vld [vmem:[%s2523_s1 + $0x610] sm:$0xff] }
  0x46   : > { %1427 = vmatmul.mubr.msk.f32.vlgmr.msra.gmra.mrb[0].mxu1 %vm264_vm2, %v625_v29  ;;  %1643 = vmatpush1.bf16.msra.mxu0 %v1642_v30  ;;  %v1475_v29 = vld [vmem:[%s2523_s1 + $0x510] sm:$0xff]  ;;  %v1482_v30 = vld [vmem:[%s2523_s1 + $0x548] sm:$0xff]  ;;  %v838_v34 = vsel %vm835_vm4, %v836_v23, %v837_v24  ;;  %v1222_v24 = vlaneseq }
  0x47   : > { %1663 = vmatpush1.bf16.msra.mxu1 %v1662_v32  ;;  %1645 = vmatprep.subr.bf16.mxu0 %v1644_v33  ;;  %v1484_v32 = vld [vmem:[%s2523_s1 + $0x558] sm:$0xff]  ;;  %v1684_v38 = vpack.c.bf16 %v1486_v31, %v1482_v30  ;;  %v1511_v21 = vld [vmem:[%s2523_s1 + $0x630] sm:$0xff] }
  0x48   : > { %1665 = vmatprep.subr.bf16.mxu1 %v1664_v37  ;;  %702 = vmatprep.mubr.f32.mxu0 %v1770_v7  ;;  %v1488_v33 = vld [vmem:[%s2523_s1 + $0x578] sm:$0xff]  ;;  %v1702_v37 = vpack.c.bf16 %v1479_v0, %v1475_v29  ;;  %v1718_v23 = vpack.c.bf16 %v1511_v21, %v1507_v20 }
  0x49   : > { %779 = vmatprep.mubr.f32.mxu1 %v1770_v7  ;;  %1426 = vmatmul.mubr.msk.f32.gmra.mrb[2].mxu0 %vm264_vm2, %v627_v45  ;;  %v1704_v43 = vpack.c.bf16 %v1488_v33, %v1484_v32 }
  0x4a   : > { %1647 = vmatpush1.bf16.msra.mxu0 %v1646_v44  ;;  %1428 = vmatmul.mubr.msk.f32.gmra.mrb[2].mxu1 %vm264_vm2, %v627_v45  ;;  %v1490_v44 = vld [vmem:[%s2523_s1 + $0x588] sm:$0xff] }
  0x4b   : > { %1667 = vmatpush1.bf16.msra.mxu1 %v1666_v46  ;;  %1649 = vmatprep.subr.bf16.mxu0 %v1648_v47  ;;  %v1494_v45 = vld [vmem:[%s2523_s1 + $0x5a8] sm:$0xff]  ;;  %v1492_v46 = vld [vmem:[%s2523_s1 + $0x598] sm:$0xff] }
  0x4c   : > { %1669 = vmatprep.subr.bf16.mxu1 %v1668_v51  ;;  %909 = vmatprep.mubr.f32.mxu0 %v1770_v7  ;;  %v1496_v47 = vld [vmem:[%s2523_s1 + $0x5b8] sm:$0xff]  ;;  %v1688_v51 = vpack.c.bf16 %v1494_v45, %v1490_v44 }
  0x4d   : > { %986 = vmatprep.mubr.f32.mxu1 %v1770_v7  ;;  %v1708_v55 = vpack.c.bf16 %v1496_v47, %v1492_v46 }
  0x4e   : > { %1651 = vmatpush1.bf16.msra.mxu0 %v1650_v57  ;;  %v1498_v57 = vld [vmem:[%s2523_s1 + $0x5c8] sm:$0xff] }
  0x4f   : > { %1671 = vmatpush1.bf16.msra.mxu1 %v1670_v58  ;;  %1653 = vmatprep.subr.bf16.mxu0 %v1652_v59  ;;  %v1502_v58 = vld [vmem:[%s2523_s1 + $0x5e8] sm:$0xff]  ;;  %v1500_v59 = vld [vmem:[%s2523_s1 + $0x5d8] sm:$0xff] }
  0x50   : > { %1673 = vmatprep.subr.bf16.mxu1 %v1672_v2  ;;  %v1692_v2 = vpack.c.bf16 %v1502_v58, %v1498_v57  ;;  %v1712_v6 = vpack.c.bf16 %v1504_v62, %v1500_v59 }
  0x52   : > { %1655 = vmatpush1.bf16.msra.mxu0 %v1654_v9  ;;  %v1506_v9 = vld [vmem:[%s2523_s1 + $0x608] sm:$0xff] }
  0x53   : > { %1675 = vmatpush1.bf16.msra.mxu1 %v1674_v10  ;;  %1657 = vmatprep.subr.bf16.mxu0 %v1656_v11  ;;  %v1510_v10 = vld [vmem:[%s2523_s1 + $0x628] sm:$0xff]  ;;  %v1508_v11 = vld [vmem:[%s2523_s1 + $0x618] sm:$0xff] }
  0x54   : > { %1677 = vmatprep.subr.bf16.mxu1 %v1676_v15  ;;  %v1696_v15 = vpack.c.bf16 %v1510_v10, %v1506_v9  ;;  %v1716_v19 = vpack.c.bf16 %v1512_v12, %v1508_v11 }
  0x56   : > { %1659 = vmatpush1.bf16.msra.mxu0 %v1658_v22  ;;  %v1698_v22 = vpack.c.bf16 %v1509_v17, %v1505_v16 }
  0x57   : > { %1679 = vmatpush1.bf16.msra.mxu1 %v1678_v25  ;;  %1681 = vmatprep.subr.bf16.mxu0 %v1680_v26  ;;  %v1223_v25 = vshrl.u32 %v1222_v24, 7 }
  0x58   : > { %1701 = vmatprep.subr.bf16.mxu1 %v1700_v61 }
  0x59   : > { %1469 = vmatmul.mubr.msk.f32.vlgmr.msra.gmra.mrb[0].mxu0 %vm264_vm2, %v838_v34  ;;  %v1224_v26 = vsub.s32 0, %v1223_v25  ;;  %v1232_v28 = vsub.s32 2, %v1223_v25  ;;  %v1236_v29 = vsub.s32 3, %v1223_v25 }
  0x5a   : > { %1471 = vmatmul.mubr.msk.f32.vlgmr.msra.gmra.mrb[0].mxu1 %vm264_vm2, %v838_v34  ;;  %1683 = vmatpush1.bf16.msra.mxu0 %v1682_v35 }
  0x5b   : > { %1703 = vmatpush1.bf16.msra.mxu1 %v1702_v37  ;;  %1685 = vmatprep.subr.bf16.mxu0 %v1684_v38  ;;  %v1225_v61 = vrot.slane %v1220_v27, %v1224_v26  ;;  %v1233_v0 = vrot.slane %v1220_v27, %v1232_v28 }
  0x5c   : > { %1705 = vmatprep.subr.bf16.mxu1 %v1704_v43  ;;  %915 = vmatprep.mubr.f32.mxu0 %v1770_v7 }
  0x5d   : > { %992 = vmatprep.mubr.f32.mxu1 %v1770_v7  ;;  %1470 = vmatmul.mubr.msk.f32.gmra.mrb[2].mxu0 %vm264_vm2, %v840_v49 }
  0x5e   : > { %1687 = vmatpush1.bf16.msra.mxu0 %v1686_v48  ;;  %1472 = vmatmul.mubr.msk.f32.gmra.mrb[2].mxu1 %vm264_vm2, %v840_v49 }
  0x5f   : > { %1707 = vmatpush1.bf16.msra.mxu1 %v1706_v50  ;;  %1689 = vmatprep.subr.bf16.mxu0 %v1688_v51 }
  0x60   : > { %1709 = vmatprep.subr.bf16.mxu1 %v1708_v55  ;;  %1122 = vmatprep.mubr.f32.mxu0 %v1770_v7 }
  0x61   : > { %1199 = vmatprep.mubr.f32.mxu1 %v1770_v7 }
  0x62   : > { %1691 = vmatpush1.bf16.msra.mxu0 %v1690_v63 }
  0x63   : > { %1711 = vmatpush1.bf16.msra.mxu1 %v1710_v1  ;;  %1693 = vmatprep.subr.bf16.mxu0 %v1692_v2 }
  0x64   : > { %1713 = vmatprep.subr.bf16.mxu1 %v1712_v6 }
  0x66   : > { %1695 = vmatpush1.bf16.msra.mxu0 %v1694_v13 }
  0x67   : > { %1715 = vmatpush1.bf16.msra.mxu1 %v1714_v14  ;;  %1697 = vmatprep.subr.bf16.mxu0 %v1696_v15 }
  0x68   : > { %1717 = vmatprep.subr.bf16.mxu1 %v1716_v19 }
  0x6a   : > { %1699 = vmatpush1.bf16.msra.mxu0 %v1698_v22 }
  0x6b   : > { %1719 = vmatpush1.bf16.msra.mxu1 %v1718_v23 }
  0x6d   : > { %1513 = vmatmul.mubr.msk.f32.vlgmr.msra.gmra.mrb[0].mxu0 %vm264_vm2, %v1984_v18 }
  0x6e   : > { %1515 = vmatmul.mubr.msk.f32.vlgmr.msra.gmra.mrb[0].mxu1 %vm264_vm2, %v1984_v18  ;;  %1128 = vmatprep.mubr.f32.mxu0 %v1770_v7  ;;  %v1228_v18 = vsub.s32 1, %v1223_v25 }
  0x6f   : > { %1205 = vmatprep.mubr.f32.mxu1 %v1770_v7  ;;  %v1237_v7 = vrot.slane %v1220_v27, %v1236_v29 }
  0x70   : > { %v1229_v30 = vrot.slane %v1220_v27, %v1228_v18 }
  0x71   : > { %1514 = vmatmul.mubr.msk.f32.gmra.mrb[2].mxu0 %vm264_vm2, %v2079_v60 }
  0x72   : > { %1516 = vmatmul.mubr.msk.f32.gmra.mrb[2].mxu1 %vm264_vm2, %v2079_v60 }
 0x140   : > { %v1124_v31 = vpop.f32.mrb[0].mxu0 }
 0x141   : > { %v1242_v32 = vadd.f32 %v1225_v61, %v1124_v31  ;;  %v1201_v33 = vpop.f32.mrb[0].mxu1  ;;  %v1126_v34 = vpop.f32.mrb[1].mxu0 }
 0x142   : > { %v1244_v60 = vadd.f32 %v1233_v0, %v1201_v33  ;;  %v1243_v35 = vadd.f32 %v1229_v30, %v1126_v34  ;;  %v1203_v36 = vpop.f32.mrb[1].mxu1 }
 0x143   : > { %v1250_v37 = vmax.f32 %v1242_v32, -6.0  ;;  %v1245_v38 = vadd.f32 %v1237_v7, %v1203_v36 }
 0x144   : > { %v1252_v39 = vmax.f32 %v1244_v60, -6.0  ;;  %v1251_v40 = vmax.f32 %v1243_v35, -6.0  ;;  %v1130_v41 = vpop.f32.mrb[2].mxu0 }
 0x145   : > { %v1258_v43 = vmin.f32 %v1250_v37, -6.0  ;;  %v1253_v42 = vmax.f32 %v1245_v38, -6.0  ;;  %v1246_v44 = vadd.f32 %v1225_v61, %v1130_v41  ;;  %v1207_v45 = vpop.f32.mrb[2].mxu1  ;;  %v1132_v46 = vpop.f32.mrb[3].mxu0 }
 0x146   : > { %v1260_v47 = vmin.f32 %v1252_v39, -6.0  ;;  %v1259_v48 = vmin.f32 %v1251_v40, -6.0  ;;  %v1248_v49 = vadd.f32 %v1233_v0, %v1207_v45  ;;  %v1247_v50 = vadd.f32 %v1229_v30, %v1132_v46  ;;  %v1209_v51 = vpop.f32.mrb[3].mxu1 }
 0x147   : > { %1266 = vst [vmem:[%s2509_s26] sm:$0xff] %v1258_v43  ;;  %v1261_v52 = vmin.f32 %v1253_v42, -6.0  ;;  %v1254_v53 = vmax.f32 %v1246_v44, -6.0  ;;  %v1249_v54 = vadd.f32 %v1237_v7, %v1209_v51 }
 0x148   : > { %1268 = vst [vmem:[%s2509_s26 + $0x10] sm:$0xff] %v1260_v47  ;;  %1267 = vst [vmem:[%s2509_s26 + $0x8] sm:$0xff] %v1259_v48  ;;  %v1256_v55 = vmax.f32 %v1248_v49, -6.0  ;;  %v1255_v56 = vmax.f32 %v1247_v50, -6.0 }
 0x149   : > { %1269 = vst [vmem:[%s2509_s26 + $0x18] sm:$0xff] %v1261_v52  ;;  %v1262_v57 = vmin.f32 %v1254_v53, -6.0  ;;  %v1257_v58 = vmax.f32 %v1249_v54, -6.0 }
 0x14a   : > { %v1264_v59 = vmin.f32 %v1256_v55, -6.0  ;;  %v1263_v62 = vmin.f32 %v1255_v56, -6.0 }
 0x14b   : > { %1270 = vst [vmem:[%s2509_s26 + $0x20] sm:$0xff] %v1262_v57  ;;  %v1265_v63 = vmin.f32 %v1257_v58, -6.0 }
 0x14c   : > { %1272 = vst [vmem:[%s2509_s26 + $0x30] sm:$0xff] %v1264_v59  ;;  %1271 = vst [vmem:[%s2509_s26 + $0x28] sm:$0xff] %v1263_v62 }
 0x14d   : > { %1273 = vst [vmem:[%s2509_s26 + $0x38] sm:$0xff] %v1265_v63 }
 0x14e PF: > { %s13_s12 = sadd.s32 1, %s1768_s12  }
 0x14f   : > { %p10_p4 = scmp.ge.s32.totalorder %s13_s12, 4  }
 0x151   :  { %12 = sbr.rel (!%p10_p4) target bundleno = 1 (0x1), region = 66 }

</bundles_post_ra>
